<compile_context>
chip_gen: v7x
topology: tpu7x:2x2x1
jax: 0.10.0
libtpu: 0.0.40
codegen_flags: <defaults>
</compile_context>

<pallas_src>
import functools

import jax
import jax.numpy as jnp
from jax.experimental import pallas as pl
from jax.experimental.pallas import tpu as pltpu


_LANE = 128
_OUT_BLOCK = (8, 128)  # lane-dense per-tile partial-sum block


def _round_up(x, m):
    return ((x + m - 1) // m) * m


def _validator_kernel(
    ht_ref,                                            # (D, TN) bf16, nodes on lanes
    w1_ref, b1_ref, w2_ref, b2_ref, w3_ref, b3_ref,    # fused, transposed MLP
    out_ref,                                           # (8, 128) f32 partial block
    *,
    num_nodes,
    tile_nodes,
    needs_mask,
):
    x = ht_ref[...]                                    # (D, TN) bf16

    # Fused 3-layer MLP in feature-major form.  Rows of the result are the two
    # analyzer scores (hydrophobicity, helix); columns are nodes (lane-dense).
    z = jnp.dot(w1_ref[...], x, preferred_element_type=jnp.float32) + b1_ref[...]
    z = jnp.maximum(z, 0.0).astype(jnp.bfloat16)
    z = jnp.dot(w2_ref[...], z, preferred_element_type=jnp.float32) + b2_ref[...]
    z = jnp.maximum(z, 0.0).astype(jnp.bfloat16)
    z = jnp.dot(w3_ref[...], z, preferred_element_type=jnp.float32) + b3_ref[...]
    s = jax.nn.sigmoid(z)                              # (2, TN) f32

    inv = jnp.float32(1.0 / float(_OUT_BLOCK[0] * _OUT_BLOCK[1]))

    def write(vals):
        # Broadcast tile_total/1024 into the lane-dense (8,128) block so the
        # wrapper can do a plain dense jnp.sum over all partials.
        total = jnp.sum(vals, keepdims=True)           # (1, 1)
        out_ref[...] = jnp.broadcast_to(total * inv, out_ref.shape)

    if needs_mask:
        i = pl.program_id(0)
        is_last = i == pl.num_programs(0) - 1

        @pl.when(is_last)
        def _():  # only the last tile contains padded node columns
            cols = (jax.lax.broadcasted_iota(jnp.int32, s.shape, 1)
                    + i * tile_nodes)
            write(jnp.where(cols < num_nodes, s, 0.0))

        @pl.when(jnp.logical_not(is_last))
        def _():
            write(s)
    else:
        write(s)


def _fuse_params(params):
    """Pack the two analyzers into one MLP, then transpose for feature-major.

    Returned weights are bf16 with shape [out, in] (y = W @ x), biases are f32
    column vectors [out, 1].
    """
    (w1h, b1h, w2h, b2h, w3h, b3h,
     w1x, b1x, w2x, b2x, w3x, b3x) = params
    H = w1h.shape[1]
    half = w2h.shape[1]

    w1 = jnp.concatenate([w1h, w1x], axis=1)                     # (D, 2H)
    b1 = jnp.concatenate([b1h, b1x], axis=1)                     # (1, 2H)

    zH = jnp.zeros((H, half), w2h.dtype)
    w2 = jnp.block([[w2h, zH], [zH, w2x]])                       # (2H, 2*half)
    b2 = jnp.concatenate([b2h, b2x], axis=1)                     # (1, 2*half)

    zh = jnp.zeros((half, 1), w3h.dtype)
    w3 = jnp.block([[w3h, zh], [zh, w3x]])                       # (2*half, 2)
    b3 = jnp.concatenate([b3h, b3x], axis=1)                     # (1, 2)

    to_wt = lambda w: jnp.asarray(w.T, jnp.bfloat16)
    to_bt = lambda b: jnp.asarray(b.T, jnp.float32)
    return (to_wt(w1), to_bt(b1), to_wt(w2), to_bt(b2), to_wt(w3), to_bt(b3))


def transmembrane_validator_forward(h, pos, batch, params, *, tile_nodes=8192):
    """Pallas forward. pos/batch are unused by the reference module's forward."""
    del pos, batch  # unused in the original forward pass
    num_nodes, input_dim = h.shape

    w1, b1, w2, b2, w3, b3 = _fuse_params(params)
    h1, h2, h3 = int(w1.shape[0]), int(w2.shape[0]), int(w3.shape[0])

    # ---- Tile sizing: the node dimension rides the 128-lane axis. ----
    tn = _round_up(max(int(tile_nodes), _LANE), _LANE)
    n128 = _round_up(num_nodes, _LANE)
    tn = min(tn, n128)
    # v7x megacore: guarantee >= 2 tiles whenever the problem allows, so both
    # TensorCores get work on the 'parallel' grid axis.  Harmless on v5e/v6e.
    if n128 >= 2 * _LANE:
        tn = min(tn, _round_up((n128 + 1) // 2, _LANE))
    num_padded = _round_up(num_nodes, tn)
    num_tiles = num_padded // tn
    needs_mask = bool(num_padded != num_nodes)

    # Feature-major bf16 activations (nodes -> lanes); zero-pad extra columns.
    ht = jnp.asarray(h, jnp.bfloat16).T                          # (D, N)
    if needs_mask:
        ht = jnp.pad(ht, ((0, 0), (0, num_padded - num_nodes)))

    # ---- VMEM limit derived from the actual footprint (v7x: 64 MiB/TC). ----
    weight_bytes = sum(int(a.size) * a.dtype.itemsize
                       for a in (w1, b1, w2, b2, w3, b3))
    act_bytes = tn * (4 * (h1 + h2 + h3) + 2 * (h1 + h2))        # f32 z + bf16 casts
    footprint = (2 * tn * input_dim * 2        # hT tile, double-buffered bf16
                 + 2 * weight_bytes            # weights (double-buffered, tiny)
                 + 2 * _OUT_BLOCK[0] * _OUT_BLOCK[1] * 4
                 + act_bytes)
    vmem_limit = max(16 << 20, min(int(footprint * 2) + (2 << 20), 60 << 20))

    # Advisory cost estimate for XLA's scheduler.
    flops = 2 * num_padded * (input_dim * h1 + h1 * h2 + h2 * h3)
    transcendentals = num_padded * h3
    bytes_accessed = (num_padded * input_dim * 2 + weight_bytes
                      + num_tiles * _OUT_BLOCK[0] * _OUT_BLOCK[1] * 4)
    cost = pl.CostEstimate(flops=int(flops),
                           transcendentals=int(transcendentals),
                           bytes_accessed=int(bytes_accessed))

    kernel = functools.partial(_validator_kernel, num_nodes=num_nodes,
                               tile_nodes=tn, needs_mask=needs_mask)

    full = lambda arr: pl.BlockSpec(arr.shape, lambda i: (0, 0))

    partials = pl.pallas_call(
        kernel,
        out_shape=jax.ShapeDtypeStruct((num_tiles * _OUT_BLOCK[0], _OUT_BLOCK[1]),
                                       jnp.float32),
        grid_spec=pltpu.PrefetchScalarGridSpec(
            num_scalar_prefetch=0,
            grid=(num_tiles,),
            in_specs=[
                pl.BlockSpec((input_dim, tn), lambda i: (0, i)),
                full(w1), full(b1), full(w2), full(b2), full(w3), full(b3),
            ],
            out_specs=pl.BlockSpec(_OUT_BLOCK, lambda i: (i, 0)),
        ),
        compiler_params=pltpu.CompilerParams(
            dimension_semantics=("parallel",),
            vmem_limit_bytes=int(vmem_limit),
        ),
        cost_estimate=cost,
    )(ht, w1, b1, w2, b2, w3, b3)

    # Each (8,128) block sums exactly to its tile's score total -> dense sum.
    total = jnp.sum(partials)
    return 0.5 * total / jnp.float32(num_nodes)


def init_params(key, input_dim, hidden_dim):
    """Deterministic synthetic parameters (weights stored [in, out], f32)."""
    half = hidden_dim // 2
    ks = jax.random.split(key, 12)

    def lin(kw, kb, fan_in, fan_out):
        scale = 1.0 / jnp.sqrt(jnp.float32(fan_in))
        w = jax.random.uniform(kw, (fan_in, fan_out), jnp.float32, -scale, scale)
        b = jax.random.uniform(kb, (1, fan_out), jnp.float32, -scale, scale)
        return w, b

    w1h, b1h = lin(ks[0], ks[1], input_dim, hidden_dim)
    w2h, b2h = lin(ks[2], ks[3], hidden_dim, half)
    w3h, b3h = lin(ks[4], ks[5], half, 1)
    w1x, b1x = lin(ks[6], ks[7], input_dim, hidden_dim)
    w2x, b2x = lin(ks[8], ks[9], hidden_dim, half)
    w3x, b3x = lin(ks[10], ks[11], half, 1)
    return (w1h, b1h, w2h, b2h, w3h, b3h,
            w1x, b1x, w2x, b2x, w3x, b3x)


def reference_forward(h, params):
    """Pure-JAX f32 reference for correctness checking."""
    (w1h, b1h, w2h, b2h, w3h, b3h,
     w1x, b1x, w2x, b2x, w3x, b3x) = params

    def mlp(x, w1, b1, w2, b2, w3, b3):
        z = jnp.maximum(x @ w1 + b1, 0.0)
        z = jnp.maximum(z @ w2 + b2, 0.0)
        return jax.nn.sigmoid(z @ w3 + b3)

    s1 = mlp(h, w1h, b1h, w2h, b2h, w3h, b3h)
    s2 = mlp(h, w1x, b1x, w2x, b2x, w3x, b3x)
    return jnp.mean((s1 + s2) / 2.0)


if __name__ == "__main__":
    input_dim, hidden_dim = 16, 32
    ATOL = 2e-2  # bf16 matmul inputs -> relaxed tolerance

    key = jax.random.PRNGKey(0)
    k_h, k_pos, k_params = jax.random.split(key, 3)
    params = init_params(k_params, input_dim, hidden_dim)

    # Case 1: small, single (padded+masked) tile.
    num_nodes = 16
    h = jax.random.normal(k_h, (num_nodes, input_dim), jnp.float32)
    pos = jax.random.normal(k_pos, (num_nodes, 3), jnp.float32)
    batch = jnp.zeros((num_nodes,), jnp.int32)
    score = jax.block_until_ready(
        transmembrane_validator_forward(h, pos, batch, params))
    ref = reference_forward(h, params)
    assert jnp.allclose(score, ref, atol=ATOL), (score, ref)

    # Case 2: node count not a multiple of 128 -> multiple tiles, masked last.
    num_nodes2 = 300
    h2 = jax.random.normal(jax.random.PRNGKey(7), (num_nodes2, input_dim),
                           jnp.float32)
    score2 = jax.block_until_ready(
        transmembrane_validator_forward(
            h2, jnp.zeros((num_nodes2, 3)), jnp.zeros((num_nodes2,), jnp.int32),
            params, tile_nodes=128))
    ref2 = reference_forward(h2, params)
    assert jnp.allclose(score2, ref2, atol=ATOL), (score2, ref2)

    # Case 3: exact multiple of the tile -> unmasked, >=2 parallel tiles.
    num_nodes3 = 256
    h3 = jax.random.normal(jax.random.PRNGKey(11), (num_nodes3, input_dim),
                           jnp.float32)
    score3 = jax.block_until_ready(
        transmembrane_validator_forward(
            h3, jnp.zeros((num_nodes3, 3)), jnp.zeros((num_nodes3,), jnp.int32),
            params, tile_nodes=128))
    ref3 = reference_forward(h3, params)
    assert jnp.allclose(score3, ref3, atol=ATOL), (score3, ref3)

    print("KERNEL_OK")
</pallas_src>

<mosaic_0001>
module attributes {stable_mosaic.version = 11 : i64} {
  func.func @_validator_kernel(%arg0: i32, %arg1: memref<16x128xbf16, #tpu.memory_space<vmem>>, %arg2: memref<64x16xbf16, #tpu.memory_space<vmem>>, %arg3: memref<64x1xf32, #tpu.memory_space<vmem>>, %arg4: memref<32x64xbf16, #tpu.memory_space<vmem>>, %arg5: memref<32x1xf32, #tpu.memory_space<vmem>>, %arg6: memref<2x32xbf16, #tpu.memory_space<vmem>>, %arg7: memref<2x1xf32, #tpu.memory_space<vmem>>, %arg8: memref<8x128xf32, #tpu.memory_space<vmem>>) attributes {dimension_semantics = [#tpu.dimension_semantics<parallel>], iteration_bounds = array<i64: 1>, scalar_prefetch = 0 : i64, scratch_operands = 0 : i64, tpu.core_type = #tpu.core_type<tc>, window_params = [{transform_indices = @transform_0, window_bounds = array<i64: 16, 128>}, {pipeline_mode = #tpu.pipeline_mode<synchronous>, transform_indices = @transform_1, window_bounds = array<i64: 64, 16>}, {pipeline_mode = #tpu.pipeline_mode<synchronous>, transform_indices = @transform_2, window_bounds = array<i64: 64, 1>}, {pipeline_mode = #tpu.pipeline_mode<synchronous>, transform_indices = @transform_3, window_bounds = array<i64: 32, 64>}, {pipeline_mode = #tpu.pipeline_mode<synchronous>, transform_indices = @transform_4, window_bounds = array<i64: 32, 1>}, {pipeline_mode = #tpu.pipeline_mode<synchronous>, transform_indices = @transform_5, window_bounds = array<i64: 2, 32>}, {pipeline_mode = #tpu.pipeline_mode<synchronous>, transform_indices = @transform_6, window_bounds = array<i64: 2, 1>}, {transform_indices = @transform_7, window_bounds = array<i64: 8, 128>}]} {
    %c0 = arith.constant 0 : index
    %c0_0 = arith.constant 0 : index
    %0 = vector.load %arg1[%c0, %c0_0] : memref<16x128xbf16, #tpu.memory_space<vmem>>, vector<16x128xbf16>
    %c0_1 = arith.constant 0 : index
    %c0_2 = arith.constant 0 : index
    %1 = vector.load %arg2[%c0_1, %c0_2] : memref<64x16xbf16, #tpu.memory_space<vmem>>, vector<64x16xbf16>
    %cst = arith.constant dense<0.000000e+00> : vector<64x128xf32>
    %2 = tpu.matmul %1, %0, %cst {dimension_numbers = #tpu.dot_dimension_numbers<[1], [0], [0], [1], [0, 0, 1, 1], [], []>} : vector<64x16xbf16>, vector<16x128xbf16>, vector<64x128xf32> -> vector<64x128xf32>
    %c0_3 = arith.constant 0 : index
    %c0_4 = arith.constant 0 : index
    %3 = vector.load %arg3[%c0_3, %c0_4] : memref<64x1xf32, #tpu.memory_space<vmem>>, vector<64x1xf32>
    %4 = vector.broadcast %3 : vector<64x1xf32> to vector<64x128xf32>
    %5 = arith.addf %2, %4 : vector<64x128xf32>
    %cst_5 = arith.constant 0.000000e+00 : f32
    %6 = vector.broadcast %cst_5 : f32 to vector<64x128xf32>
    %7 = arith.maximumf %5, %6 : vector<64x128xf32>
    %8 = arith.truncf %7 : vector<64x128xf32> to vector<64x128xbf16>
    %c0_6 = arith.constant 0 : index
    %c0_7 = arith.constant 0 : index
    %9 = vector.load %arg4[%c0_6, %c0_7] : memref<32x64xbf16, #tpu.memory_space<vmem>>, vector<32x64xbf16>
    %cst_8 = arith.constant dense<0.000000e+00> : vector<32x128xf32>
    %10 = tpu.matmul %9, %8, %cst_8 {dimension_numbers = #tpu.dot_dimension_numbers<[1], [0], [0], [1], [0, 0, 1, 1], [], []>} : vector<32x64xbf16>, vector<64x128xbf16>, vector<32x128xf32> -> vector<32x128xf32>
    %c0_9 = arith.constant 0 : index
    %c0_10 = arith.constant 0 : index
    %11 = vector.load %arg5[%c0_9, %c0_10] : memref<32x1xf32, #tpu.memory_space<vmem>>, vector<32x1xf32>
    %12 = vector.broadcast %11 : vector<32x1xf32> to vector<32x128xf32>
    %13 = arith.addf %10, %12 : vector<32x128xf32>
    %cst_11 = arith.constant 0.000000e+00 : f32
    %14 = vector.broadcast %cst_11 : f32 to vector<32x128xf32>
    %15 = arith.maximumf %13, %14 : vector<32x128xf32>
    %16 = arith.truncf %15 : vector<32x128xf32> to vector<32x128xbf16>
    %c0_12 = arith.constant 0 : index
    %c0_13 = arith.constant 0 : index
    %17 = vector.load %arg6[%c0_12, %c0_13] : memref<2x32xbf16, #tpu.memory_space<vmem>>, vector<2x32xbf16>
    %cst_14 = arith.constant dense<0.000000e+00> : vector<2x128xf32>
    %18 = tpu.matmul %17, %16, %cst_14 {dimension_numbers = #tpu.dot_dimension_numbers<[1], [0], [0], [1], [0, 0, 1, 1], [], []>} : vector<2x32xbf16>, vector<32x128xbf16>, vector<2x128xf32> -> vector<2x128xf32>
    %c0_15 = arith.constant 0 : index
    %c0_16 = arith.constant 0 : index
    %19 = vector.load %arg7[%c0_15, %c0_16] : memref<2x1xf32, #tpu.memory_space<vmem>>, vector<2x1xf32>
    %20 = vector.broadcast %19 : vector<2x1xf32> to vector<2x128xf32>
    %21 = arith.addf %18, %20 : vector<2x128xf32>
    %22 = arith.negf %21 : vector<2x128xf32>
    %23 = math.exp %22 : vector<2x128xf32>
    %cst_17 = arith.constant 1.000000e+00 : f32
    %24 = vector.broadcast %cst_17 : f32 to vector<2x128xf32>
    %25 = arith.addf %24, %23 : vector<2x128xf32>
    %26 = arith.divf %24, %25 : vector<2x128xf32>
    %c0_i32 = arith.constant 0 : i32
    %27 = arith.cmpi eq, %arg0, %c0_i32 : i32
    %28 = arith.extui %27 : i1 to i32
    %cst_18 = arith.constant 9.765625E-4 : f32
    %c0_i32_19 = arith.constant 0 : i32
    %29 = arith.cmpi ne, %28, %c0_i32_19 : i32
    scf.if %29 {
      %33 = tpu.iota {dimensions = array<i32: 1>} : vector<2x128xi32>
      %c128_i32 = arith.constant 128 : i32
      %34 = arith.muli %arg0, %c128_i32 : i32
      %35 = vector.broadcast %34 : i32 to vector<2x128xi32>
      %36 = arith.addi %33, %35 : vector<2x128xi32>
      %c16_i32 = arith.constant 16 : i32
      %37 = vector.broadcast %c16_i32 : i32 to vector<2x128xi32>
      %38 = arith.cmpi slt, %36, %37 : vector<2x128xi32>
      %cst_22 = arith.constant 0.000000e+00 : f32
      %39 = vector.broadcast %cst_22 : f32 to vector<2x128xf32>
      %40 = arith.select %38, %26, %39 : vector<2x128xi1>, vector<2x128xf32>
      %41 = vector.shape_cast %40 : vector<2x128xf32> to vector<1x2x128xf32>
      %cst_23 = arith.constant dense<0.000000e+00> : vector<1xf32>
      %42 = vector.multi_reduction <add>, %41, %cst_23 [1, 2] : vector<1x2x128xf32> to vector<1xf32>
      %43 = vector.shape_cast %42 : vector<1xf32> to vector<1x1x1xf32>
      %44 = vector.extract %43[0, 0, 0] : f32 from vector<1x1x1xf32>
      %45 = vector.broadcast %44 : f32 to vector<1x1xf32>
      %46 = vector.broadcast %cst_18 : f32 to vector<1x1xf32>
      %47 = arith.mulf %45, %46 : vector<1x1xf32>
      %48 = vector.shape_cast %47 : vector<1x1xf32> to vector<1x1xf32>
      %49 = vector.broadcast %48 : vector<1x1xf32> to vector<8x128xf32>
      %c0_24 = arith.constant 0 : index
      %c0_25 = arith.constant 0 : index
      %50 = vector.load %arg8[%c0_24, %c0_25] : memref<8x128xf32, #tpu.memory_space<vmem>>, vector<8x128xf32>
      tpu.vector_store %arg8[%c0_24, %c0_25], %49 {strides = array<i32>} : memref<8x128xf32, #tpu.memory_space<vmem>>, vector<8x128xf32>,
    } else {
    }
    %true = arith.constant true
    %30 = arith.xori %27, %true : i1
    %31 = arith.extui %30 : i1 to i32
    %cst_20 = arith.constant 9.765625E-4 : f32
    %c0_i32_21 = arith.constant 0 : i32
    %32 = arith.cmpi ne, %31, %c0_i32_21 : i32
    scf.if %32 {
      %33 = vector.shape_cast %26 : vector<2x128xf32> to vector<1x2x128xf32>
      %cst_22 = arith.constant dense<0.000000e+00> : vector<1xf32>
      %34 = vector.multi_reduction <add>, %33, %cst_22 [1, 2] : vector<1x2x128xf32> to vector<1xf32>
      %35 = vector.shape_cast %34 : vector<1xf32> to vector<1x1x1xf32>
      %36 = vector.extract %35[0, 0, 0] : f32 from vector<1x1x1xf32>
      %37 = vector.broadcast %36 : f32 to vector<1x1xf32>
      %38 = vector.broadcast %cst_20 : f32 to vector<1x1xf32>
      %39 = arith.mulf %37, %38 : vector<1x1xf32>
      %40 = vector.shape_cast %39 : vector<1x1xf32> to vector<1x1xf32>
      %41 = vector.broadcast %40 : vector<1x1xf32> to vector<8x128xf32>
      %c0_23 = arith.constant 0 : index
      %c0_24 = arith.constant 0 : index
      %42 = vector.load %arg8[%c0_23, %c0_24] : memref<8x128xf32, #tpu.memory_space<vmem>>, vector<8x128xf32>
      tpu.vector_store %arg8[%c0_23, %c0_24], %41 {strides = array<i32>} : memref<8x128xf32, #tpu.memory_space<vmem>>, vector<8x128xf32>,
    } else {
    }
    return
  }
  func.func @transform_0(%arg0: i32) -> (i32, i32) {
    %c0_i32 = arith.constant 0 : i32
    %c0_i32_0 = arith.constant 0 : i32
    return %c0_i32, %arg0 : i32, i32
  }
  func.func @transform_1(%arg0: i32) -> (i32, i32) {
    %c0_i32 = arith.constant 0 : i32
    %c0_i32_0 = arith.constant 0 : i32
    %c0_i32_1 = arith.constant 0 : i32
    return %c0_i32, %c0_i32_0 : i32, i32
  }
  func.func @transform_2(%arg0: i32) -> (i32, i32) {
    %c0_i32 = arith.constant 0 : i32
    %c0_i32_0 = arith.constant 0 : i32
    %c0_i32_1 = arith.constant 0 : i32
    return %c0_i32, %c0_i32_0 : i32, i32
  }
  func.func @transform_3(%arg0: i32) -> (i32, i32) {
    %c0_i32 = arith.constant 0 : i32
    %c0_i32_0 = arith.constant 0 : i32
    %c0_i32_1 = arith.constant 0 : i32
    return %c0_i32, %c0_i32_0 : i32, i32
  }
  func.func @transform_4(%arg0: i32) -> (i32, i32) {
    %c0_i32 = arith.constant 0 : i32
    %c0_i32_0 = arith.constant 0 : i32
    %c0_i32_1 = arith.constant 0 : i32
    return %c0_i32, %c0_i32_0 : i32, i32
  }
  func.func @transform_5(%arg0: i32) -> (i32, i32) {
    %c0_i32 = arith.constant 0 : i32
    %c0_i32_0 = arith.constant 0 : i32
    %c0_i32_1 = arith.constant 0 : i32
    return %c0_i32, %c0_i32_0 : i32, i32
  }
  func.func @transform_6(%arg0: i32) -> (i32, i32) {
    %c0_i32 = arith.constant 0 : i32
    %c0_i32_0 = arith.constant 0 : i32
    %c0_i32_1 = arith.constant 0 : i32
    return %c0_i32, %c0_i32_0 : i32, i32
  }
  func.func @transform_7(%arg0: i32) -> (i32, i32) {
    %c0_i32 = arith.constant 0 : i32
    %c0_i32_0 = arith.constant 0 : i32
    return %arg0, %c0_i32 : i32, i32
  }
}

</mosaic_0001>

<bundles_post_ra>
// kernel: tpu_custom_call.1
= control target key start
LH: loop header
LB: loop body
LE: loop exit
PB: predicated region body
PF: predicated region fallthrough
CT: control target
= control target key end

     0   :  { %vm112_vm0 = vcmask 130048   ;;  %v517_v3 = vmov 0   ;;  %s642_s0 = inlined_call_operand.vmem [shape: bf16[16,128], index: 0, kind: input, shape index: {}]   ;;  %s643_s1 = inlined_call_operand.vmem [shape: bf16[64,16], index: 1, kind: input, shape index: {}]   ;;  %s644_s2 = inlined_call_operand.vmem [shape: f32[64,1], index: 2, kind: input, shape index: {}]   ;;  %s645_s3 = inlined_call_operand.vmem [shape: bf16[32,64], index: 3, kind: input, shape index: {}]   ;;  %s646_s4 = inlined_call_operand.vmem [shape: f32[32,1], index: 4, kind: input, shape index: {}]   ;;  %s647_s5 = inlined_call_operand.vmem [shape: bf16[2,32], index: 5, kind: input, shape index: {}]   ;;  %s648_s6 = inlined_call_operand.vmem [shape: f32[2,1], index: 6, kind: input, shape index: {}]   ;;  %s649_s7 = inlined_call_operand.hbm [shape: f32[8,128], index: 7, kind: output, shape index: {}]  }
   0x1   :  { %v482_v0 = vld [vmem:[%s642_s0] sm:$0xff]   ;;  %v484_v2 = vld [vmem:[%s643_s1 + $0x8] sm:$0xff]   ;;  %480 = vset.pattern.permute.xlu0 %v517_v3  ;;  %v485_v4 = vld [vmem:[%s643_s1 + $0x10] sm:$0xff]   ;;  %481 = vset.pattern.permute.xlu1 %v517_v3 }
   0x2   :  { %v483_v1 = vld [vmem:[%s643_s1] sm:$0xff]   ;;  %444 = vmatprep.subr.bf16.mxu0 %v482_v0  ;;  %v40_v6 = vld [vmem:[%s644_s2 + $0x10] sm:$0xff]  ;;  %v39_v7 = vld [vmem:[%s644_s2 + $0x8] sm:$0xff] }
   0x3   :  { %445 = vmatpush3.bf16.msra.mxu0 %v482_v0  ;;  %446 = vmatprep.mubr.msk.bf16.mxu0 %vm112_vm0, %v483_v1  ;;  %v38_v5 = vld [vmem:[%s644_s2] sm:$0xff]  ;;  %v41_v8 = vld [vmem:[%s644_s2 + $0x18] sm:$0xff] }
   0x4   :  { %48 = vperm.xlu0 %480, %v38_v5   ;;  %58 = vperm.xlu1 %481, %v40_v6   ;;  %v486_v9 = vld [vmem:[%s643_s1 + $0x18] sm:$0xff]  }
   0x6   :  { %447 = vmatmul.mubr.msk.bf16.vlgmr.msra.gmra.mrb[0].mxu0 %vm112_vm0, %v484_v2 }
   0x7   :  { %450 = vmatprep.mubr.msk.bf16.mxu0 %vm112_vm0, %v485_v4 }
   0x8   :  { %53 = vperm.xlu0 %480, %v39_v7  }
   0x9   :  { %12 = vsyncpa [#allocation3], 0  ;;  %v42_v10 = vld [vmem:[%s644_s2 + $0x20] sm:$0xff]  ;;  %63 = vperm.xlu1 %481, %v41_v8   ;;  %v43_v11 = vld [vmem:[%s644_s2 + $0x28] sm:$0xff]  ;;  %vm240_vm1 = vcmask 523264   ;;  %v518_v57 = vmov 0.0  }
   0xa   :  { %v44_v12 = vld [vmem:[%s644_s2 + $0x30] sm:$0xff]  ;;  %v45_v13 = vld [vmem:[%s644_s2 + $0x38] sm:$0xff]  ;;  %v206_v14 = vld [vmem:[%s646_s4] sm:$0xff]  ;;  %466 = vmatprep.subr.bf16.mxu0 %v518_v57  ;;  %vm519_vm2 = vmmov 0   ;;  %vm309_vm3 = vcmask 261120   ;;  %vm370_vm5 = vcmask 1041408  }
   0xb   :  { %v207_v15 = vld [vmem:[%s646_s4 + $0x8] sm:$0xff]  ;;  %v208_v16 = vld [vmem:[%s646_s4 + $0x10] sm:$0xff]  ;;  %v209_v17 = vld [vmem:[%s646_s4 + $0x18] sm:$0xff] }
   0xc   :  { %68 = vperm.xlu0 %480, %v42_v10   ;;  %v303_v18 = vld [vmem:[%s648_s6] sm:$0x3]  ;;  %v488_v56 = vld [vmem:[%s645_s3 + $0x8] sm:$0xff]  }
   0xd   :  { %73 = vperm.xlu1 %481, %v43_v11   ;;  %v487_v19 = vld [vmem:[%s645_s3] sm:$0xff]  }
   0xe   :  { %451 = vmatmul.mubr.msk.bf16.gmra.mrb[4].mxu0 %vm112_vm0, %v486_v9  ;;  %462 = vmatprep.mubr.msk.bf16.mxu1 %vm240_vm1, %v487_v19 }
   0xf   :  { %470 = vmatprep.mubr.msk.bf16.mxu0 %vm519_vm2, %v518_v57 }
  0x10   :  { %78 = vperm.xlu0 %480, %v44_v12   ;;  %v302_v12 = vld [vmem:[%s647_s5] sm:$0x1]  ;;  %s520_s5 = smov [#allocation2]  }
  0x11   :  { %83 = vperm.xlu1 %481, %v45_v13   ;;  %s407_s13 = sshll.u32 %s520_s5, 4  ;;  %s408_s13 = int_to_ptr.vmem [resolvable:$true] %s407_s13 }
  0x12   :  { %s493_s15 = scalar_lea.vmem %s408_s13, 128  ;;  %p498_p1 = scmp.lt.s32.totalorder %s408_s13, %s408_s13 }
  0x13   :  { %p494_p0 = scmp.ne.s32.totalorder %s408_s13, %s493_s15  ;;  %p499_p2 = scmp.lt.s32.totalorder %s493_s15, %s493_s15 }
  0x14   :  { %212 = vperm.xlu0 %480, %v206_v14  }
  0x15   :  { %217 = vperm.xlu1 %481, %v207_v15   ;;  %p500_p3 = por %p499_p2, %p498_p1 }
  0x17   :  { %p501_p4 = pnand %p500_p3, %p494_p0 }
  0x18   :  { %222 = vperm.xlu0 %480, %v208_v16  }
  0x19   :  { %227 = vperm.xlu1 %481, %v209_v17  }
  0x1c   :  { %306 = vperm.xlu0 %480, %v303_v18  }
  0x83   :  { %v49_v20 = vpop.permute.xlu0 %48  ;;  %v59_v21 = vpop.permute.xlu1 %58 }
  0x87   :  { %v54_v22 = vpop.permute.xlu0 %53 }
  0x88   :  { %v64_v23 = vpop.permute.xlu1 %63 }
  0x8b   :  { %v69_v27 = vpop.permute.xlu0 %68 }
  0x8c   :  { %v74_v32 = vpop.permute.xlu1 %73 }
  0x8f   :  { %v79_v39 = vpop.permute.xlu0 %78 }
  0x90   :  { %v84_v44 = vpop.permute.xlu1 %83 }
  0x93   :  { %v213_v58 = vpop.permute.xlu0 %212 }
  0x94   :  { %v218_v59 = vpop.permute.xlu1 %217 }
  0x97   :  { %v223_v60 = vpop.permute.xlu0 %222 }
  0x98   :  { %v228_v0 = vpop.permute.xlu1 %227 }
  0x9b   :  { %v307_v13 = vpop.permute.xlu0 %306 }
  0xd9   :  { %v448_v24 = vpop.f32.mrb[0].mxu0 }
  0xda   :  { %v168_v25 = vadd.f32 %v448_v24, %v59_v21  ;;  %v159_v26 = vpop.f32.mrb[1].mxu0 }
  0xdb   :  { %v160_v28 = vadd.f32 %v159_v26, %v49_v20  ;;  %v449_v29 = vpop.f32.mrb[2].mxu0 }
  0xdc   :  { %v171_v30 = vadd.f32 %v449_v29, %v64_v23  ;;  %v162_v31 = vpop.f32.mrb[3].mxu0  ;;  %v192_v34 = vmax.f32 %v168_v25, 0.0 }
  0xdd   :  { %v163_v33 = vadd.f32 %v162_v31, %v54_v22  ;;  %v190_v36 = vmax.f32 %v160_v28, 0.0  ;;  %v363_v22 = vlaneseq }
  0xde   :  { %v193_v35 = vmax.f32 %v171_v30, 0.0 }
  0xdf   :  { %v191_v37 = vmax.f32 %v163_v33, 0.0  ;;  %v364_v23 = vand.u32 127, %v363_v22 }
  0xe0   :  { %v199_v38 = vpack.c.bf16 %v193_v35, %v192_v34 }
  0xe1   :  { %v452_v40 = vpop.f32.mrb[4].mxu0  ;;  %v198_v41 = vpack.c.bf16 %v191_v37, %v190_v36  ;;  %vm368_vm4 = vcmp.lt.s32.totalorder %v364_v23, 16 }
  0xe2   :  { %v184_v42 = vadd.f32 %v452_v40, %v79_v39  ;;  %v175_v43 = vpop.f32.mrb[5].mxu0 }
  0xe3   :  { %v176_v45 = vadd.f32 %v175_v43, %v69_v27  ;;  %v453_v46 = vpop.f32.mrb[6].mxu0  ;;  %454 = vmatprep.subr.bf16.mxu1 %v198_v41 }
  0xe4   :  { %v187_v47 = vadd.f32 %v453_v46, %v84_v44  ;;  %v178_v48 = vpop.f32.mrb[7].mxu0  ;;  %455 = vmatpush3.bf16.msra.mxu1 %v198_v41  ;;  %v196_v50 = vmax.f32 %v184_v42, 0.0 }
  0xe5   :  { %v179_v49 = vadd.f32 %v178_v48, %v74_v32  ;;  %456 = vmatprep.subr.bf16.mxu1 %v199_v38  ;;  %v194_v52 = vmax.f32 %v176_v45, 0.0 }
  0xe6   :  { %v197_v51 = vmax.f32 %v187_v47, 0.0 }
  0xe7   :  { %v195_v53 = vmax.f32 %v179_v49, 0.0 }
  0xe8   :  { %v201_v54 = vpack.c.bf16 %v197_v51, %v196_v50  ;;  %457 = vmatpush3.bf16.msra.mxu1 %v199_v38 }
  0xe9   :  { %v200_v55 = vpack.c.bf16 %v195_v53, %v194_v52 }
  0xeb   :  { %458 = vmatprep.subr.bf16.mxu1 %v200_v55 }
  0xec   :  { %459 = vmatpush3.bf16.msra.mxu1 %v200_v55 }
  0xed   :  { %460 = vmatprep.subr.bf16.mxu1 %v201_v54 }
  0xf0   :  { %461 = vmatpush3.bf16.msra.mxu1 %v201_v54 }
  0xf3   :  { %463 = vmatmul.mubr.msk.bf16.vlgmr.msra.gmra.mrb[0].mxu1 %vm240_vm1, %v488_v56 }
 0x1c6   :  { %v464_v61 = vpop.f32.mrb[0].mxu1 }
 0x1c7   :  { %v290_v62 = vadd.f32 %v464_v61, %v223_v60  ;;  %v281_v63 = vpop.f32.mrb[1].mxu1 }
 0x1c8   :  { %v282_v1 = vadd.f32 %v281_v63, %v213_v58  ;;  %v465_v2 = vpop.f32.mrb[2].mxu1 }
 0x1c9   :  { %v293_v3 = vadd.f32 %v465_v2, %v228_v0  ;;  %v284_v4 = vpop.f32.mrb[3].mxu1  ;;  %v298_v6 = vmax.f32 %v290_v62, 0.0 }
 0x1ca   :  { %v285_v5 = vadd.f32 %v284_v4, %v218_v59  ;;  %v296_v8 = vmax.f32 %v282_v1, 0.0 }
 0x1cb   :  { %v299_v7 = vmax.f32 %v293_v3, 0.0 }
 0x1cc   :  { %v297_v9 = vmax.f32 %v285_v5, 0.0 }
 0x1cd   :  { %v301_v10 = vpack.c.bf16 %v299_v7, %v298_v6 }
 0x1ce   :  { %v300_v11 = vpack.c.bf16 %v297_v9, %v296_v8 }
 0x1d0   :  { %467 = vmatpush3.bf16.msra.mxu0 %v300_v11 }
 0x1d1   :  { %468 = vmatprep.subr.bf16.mxu0 %v518_v57 }
 0x1d4   :  { %469 = vmatpush3.bf16.msra.mxu0 %v301_v10 }
 0x1d7   :  { %471 = vmatmul.mubr.msk.bf16.vlgmr.msra.gmra.mrb[8].mxu0 %vm309_vm3, %v302_v12 }
 0x2aa   :  { %v347_v14 = vpop.f32.mrb[8].mxu0 }
 0x2ab   :  { %v348_v15 = vadd.f32 %v347_v14, %v307_v13  ;;  %v472_v16 = vpop.f32.mrb[9].mxu0 }
 0x2ac   :  { %v350_v17 = vpop.f32.mrb[10].mxu0 }
 0x2ad   :  { %v429_v18 = vmul.f32 -1.442695, %v348_v15  ;;  %v473_v19 = vpop.f32.mrb[11].mxu0 }
 0x2af   :  { %489 = vpow2.f32 %v429_v18 }
 0x2b9   :  { %v490_v20 = vpop.eup %489 }
 0x2ba   :  { %v356_v21 = vadd.f32 1.0, %v490_v20 }
 0x2bc   :  { %491 = vrcp.f32 %v356_v21 }
 0x2c6   :  { %v492_v24 = vpop.eup %491 }
 0x2c7   :  { %v369_v25 = vsel %vm368_vm4, %v492_v24, 0.0 }
 0x2c8   :  { %v371_v26 = vsel %vm370_vm5, %v369_v25, 0.0 }
 0x2c9   :  { %372 = vadd.xlane.f32.xlu1 %v371_v26 }
 0x356   :  { %v373_v27 = vpop.xlane.xlu1 %372 }
 0x357   :  { %v374_v28 = vrot.slane %v373_v27, 4 }
 0x359   :  { %v375_v29 = vadd.f32 %v374_v28, %v373_v27 }
 0x35b   :  { %v376_v30 = vrot.slane %v375_v29, 2 }
 0x35d   :  { %v377_v31 = vadd.f32 %v376_v30, %v375_v29 }
 0x35f   :  { %v378_v32 = vrot.slane %v377_v31, 1 }
 0x361   :  { %v379_v33 = vadd.f32 %v378_v32, %v377_v31 }
 0x363   :  { %474 = vpush %v379_v33 }
 0x394   :  { %s475_s14 = spop %474 }
 0x395   :  { %v381_v34 = vstv %s475_s14 }
 0x396   :  { %v382_v35 = vmul.f32 0.0009765625, %v381_v34 }
 0x398   :  { %383 = vst [vmem:[#allocation2] sm:$0xff] %v382_v35 }
 0x399   :  { %504 = shalt.err (!%p501_p4)
}
 0x39a   :  { %s505_s18 = scalar_lea.hbm %s649_s7, 128 }
 0x39b   :  { %p506_p5 = scmp.ne.s32.totalorder %s649_s7, %s505_s18  ;;  %p509_p6 = scmp.lt.u32.totalorder %s505_s18, %s649_s7 }
 0x39d   :  { %p511_p7 = pnand %p509_p6, %p506_p5 }
 0x39f   :  { %514 = shalt.err (!%p511_p7)
}
 0x3a0   :  { %410 = dma.vmem_to_hbm [thread:$0]  %s408_s13, 128, %s649_s7, [#allocation3]  }
 0x3a1   :  { %515 = dma.done.wait [#allocation3], 128  }
 0x3a2   :  { %516 = vsyncadd [#allocation3], 4294967168 }
 0x3a3   :  { %414 = vsyncpa [#allocation3], 1 }

</bundles_post_ra>
